<compile_context>
chip_gen: v5e
topology: v5e:2x2
jax: 0.10.0
libtpu: 0.0.40
codegen_flags: <defaults>
</compile_context>

<pallas_src>
import functools
import math

import jax
import jax.numpy as jnp
from jax.experimental import pallas as pl
from jax.experimental.pallas import tpu as pltpu

N_HEAD = 4  # config.n_head


def causal_attn_kernel(x_ref, wqkv_ref, bqkv_ref, wph_ref, bp_ref,
                       y_ref, kv_ref, *, n_head):
    T, C = x_ref.shape
    H = n_head
    D = C // H

    # ---- fused QKV projection: one (T, C) x (C, 3C) MXU matmul, f32 accumulate.
    # The 1/sqrt(D) scale is pre-folded into the q columns of the fused weight.
    x = x_ref[...]                                               # (T, C) bf16
    qkv = jnp.dot(x, wqkv_ref[...], preferred_element_type=jnp.float32)
    qkv = (qkv + bqkv_ref[...]).astype(jnp.bfloat16)             # (T, 3C) bf16 slab

    # ---- new_kv_cache: k|v are contiguous columns of qkv -> single fused store.
    kv_ref[...] = qkv[:, C:].astype(kv_ref.dtype)                # (T, 2C)

    # ---- head-batched q/k/v with the head dim LEADING: (H, T, D).
    q = jnp.stack([qkv[:, h * D:(h + 1) * D] for h in range(H)], axis=0)
    k = jnp.stack([qkv[:, C + h * D:C + (h + 1) * D] for h in range(H)], axis=0)
    v = jnp.stack([qkv[:, 2 * C + h * D:2 * C + (h + 1) * D] for h in range(H)],
                  axis=0)

    # ---- additive causal mask, built once as (T, T); implicit broadcast over H.
    row = jax.lax.broadcasted_iota(jnp.int32, (T, T), 0)
    col = jax.lax.broadcasted_iota(jnp.int32, (T, T), 1)
    neg_mask = jnp.where(row >= col, 0.0, -1e30).astype(jnp.float32)   # (T, T)

    # ---- attention for all heads in one batched einsum pair (leading batch dim).
    att = jnp.einsum('hqd,hkd->hqk', q, k,
                     preferred_element_type=jnp.float32)         # (H, T, T) f32
    att = att + neg_mask                                         # implicit broadcast
    att = att - jnp.max(att, axis=-1, keepdims=True)
    p = jnp.exp(att)                                             # f32 exp (v5e-safe)
    # TODO(synk): on v6e/v7x a bf16 exp here (bf16 EUP) would ~2x softmax
    # throughput; kept f32 to stay chip-agnostic.
    inv = pl.reciprocal(jnp.sum(p, axis=-1, keepdims=True), approx=True)  # (H, T, 1)
    yh = jnp.einsum('hqk,hkd->hqd', p.astype(jnp.bfloat16), v,
                    preferred_element_type=jnp.float32)          # (H, T, D) f32
    yh = (yh * inv).astype(jnp.bfloat16)                         # fold 1/sum here
    # TODO(synk): attn_drop / resid_drop are identity (eval-mode dropout).
    # TODO(synk): for T beyond ~1k, tile the KV axis with an online softmax to
    # keep the (H, T, T) score/prob tiles out of VMEM.

    # ---- output projection with the head reorder absorbed:
    #          y @ Wp == sum_h yh[h] @ Wp[h*D:(h+1)*D, :]
    # Accumulated in f32; single lane-dense (T, C) store, no head scratch slab.
    out = jnp.zeros((T, C), jnp.float32)
    for h in range(H):                                           # H small, static
        out = out + jnp.dot(yh[h], wph_ref[h],
                            preferred_element_type=jnp.float32)
    y_ref[...] = (out + bp_ref[...]).astype(y_ref.dtype)


def causal_self_attention(x, params, n_head=N_HEAD):
    """x: (B, T, C); params: (wq, bq, wk, bk, wv, bv, wp, bp); weights are (C, C)
    already in (in, out) layout (kernel computes x @ W + b == PyTorch x @ W.T + b),
    biases are (1, C)."""
    B, T, C = x.shape
    H = n_head
    assert C % H == 0
    D = C // H
    wq, bq, wk, bk, wv, bv, wp, bp = params

    scale = 1.0 / math.sqrt(D)
    # Fuse the three projections (order q|k|v); fold the attention scale into the
    # q columns (exact, applied once to the small (C, C) weight).
    w_qkv = jnp.concatenate([wq * scale, wk, wv], axis=1).astype(jnp.bfloat16)  # (C,3C)
    b_qkv = jnp.concatenate([bq * scale, bk, bv], axis=1).astype(jnp.float32)   # (1,3C)
    wp_heads = wp.astype(jnp.bfloat16).reshape(H, D, C)   # rows of Wp grouped by head
    bp_f32 = bp.astype(jnp.float32)

    # Flatten (B, T, C) -> (B*T, C); one batch element (T rows) per grid step.
    x_flat = x.astype(jnp.bfloat16).reshape(B * T, C)

    # VMEM budget: 3/4 of physical so the compiler keeps headroom for its own
    # scratch / double-buffers (64 MiB physical on v7x, 128 MiB on v5e/v6e).
    try:
        vmem_cap = pltpu.get_tpu_info().vmem_capacity_bytes
    except Exception:  # conservative fallback
        vmem_cap = 64 * 1024 * 1024
    vmem_limit = int(vmem_cap * 3) // 4

    itemsize = jnp.dtype(x.dtype).itemsize
    flops = B * (2 * T * C * 3 * C          # fused qkv projection
                 + 4 * H * T * T * D        # QK^T + PV
                 + 2 * T * C * C)           # output projection
    cost = pl.CostEstimate(
        flops=flops,
        transcendentals=B * H * T * T,      # softmax exp
        bytes_accessed=(x_flat.size * 2 + w_qkv.size * 2 + b_qkv.size * 4
                        + wp_heads.size * 2 + bp_f32.size * 4
                        + B * T * C * itemsize + B * T * 2 * C * itemsize))

    kernel = functools.partial(causal_attn_kernel, n_head=H)
    row_spec = pl.BlockSpec((T, C), lambda b: (b, 0))

    y_flat, kv_flat = pl.pallas_call(
        kernel,
        out_shape=(jax.ShapeDtypeStruct((B * T, C), x.dtype),
                   jax.ShapeDtypeStruct((B * T, 2 * C), x.dtype)),
        grid_spec=pltpu.PrefetchScalarGridSpec(
            num_scalar_prefetch=0,
            grid=(B,),
            in_specs=[row_spec,
                      pl.BlockSpec((C, 3 * C), lambda b: (0, 0)),
                      pl.BlockSpec((1, 3 * C), lambda b: (0, 0)),
                      pl.BlockSpec((H, D, C), lambda b: (0, 0, 0)),
                      pl.BlockSpec((1, C), lambda b: (0, 0))],
            out_specs=(row_spec,
                       pl.BlockSpec((T, 2 * C), lambda b: (b, 0)))),
        compiler_params=pltpu.CompilerParams(
            dimension_semantics=("parallel",),
            vmem_limit_bytes=vmem_limit),
        cost_estimate=cost,
    )(x_flat, w_qkv, b_qkv, wp_heads, bp_f32)

    y = y_flat.reshape(B, T, C)
    kv = kv_flat.reshape(B, T, 2 * C)
    # TODO(synk): the incremental-decoding kv_cache branch of the PyTorch module
    # is not implemented; this covers the full-sequence (kv_cache=None) forward.
    return y, (kv[..., :C], kv[..., C:])


def _reference(x, params, n_head):
    """Pure-JAX f32 reference mirroring the PyTorch forward (no kv_cache, no dropout)."""
    B, T, C = x.shape
    wq, bq, wk, bk, wv, bv, wp, bp = params
    D = C // n_head
    q = x @ wq + bq[0]
    k = x @ wk + bk[0]
    v = x @ wv + bv[0]
    qh = q.reshape(B, T, n_head, D).transpose(0, 2, 1, 3)
    kh = k.reshape(B, T, n_head, D).transpose(0, 2, 1, 3)
    vh = v.reshape(B, T, n_head, D).transpose(0, 2, 1, 3)
    att = jnp.einsum('bhtd,bhsd->bhts', qh, kh) / math.sqrt(D)
    mask = jnp.tril(jnp.ones((T, T), dtype=bool))
    att = jnp.where(mask, att, -jnp.inf)
    att = jax.nn.softmax(att, axis=-1)
    y = jnp.einsum('bhts,bhsd->bhtd', att, vh)
    y = y.transpose(0, 2, 1, 3).reshape(B, T, C)
    y = y @ wp + bp[0]
    return y, (k, v)


if __name__ == "__main__":
    B, T, C = 2, 8, 32   # batch, block_size (seq), n_embd; n_head = 4
    key = jax.random.PRNGKey(0)
    kx, kq, kbq, kk, kbk, kv_, kbv, kp, kbp = jax.random.split(key, 9)

    bound = 1.0 / math.sqrt(C)   # PyTorch nn.Linear default init range
    def uinit(k, shape):
        return jax.random.uniform(k, shape, jnp.float32, -bound, bound)

    x = jax.random.normal(kx, (B, T, C), jnp.float32)
    params = (
        uinit(kq, (C, C)), uinit(kbq, (1, C)),
        uinit(kk, (C, C)), uinit(kbk, (1, C)),
        uinit(kv_, (C, C)), uinit(kbv, (1, C)),
        uinit(kp, (C, C)), uinit(kbp, (1, C)),
    )

    y, (k_out, v_out) = causal_self_attention(x, params)
    jax.block_until_ready((y, k_out, v_out))

    # Kernel uses bf16 matmul inputs / kv slab with f32 accumulation -> loosened
    # tolerance vs. the pure-f32 reference.
    y_ref, (k_ref, v_ref) = _reference(x, params, N_HEAD)
    assert jnp.allclose(y, y_ref, atol=2e-2, rtol=2e-2)
    assert jnp.allclose(k_out, k_ref, atol=2e-2, rtol=2e-2)
    assert jnp.allclose(v_out, v_ref, atol=2e-2, rtol=2e-2)

    print("KERNEL_OK")
</pallas_src>

<mosaic_0001>
module attributes {stable_mosaic.version = 11 : i64} {
  func.func @causal_attn_kernel(%arg0: i32, %arg1: memref<8x32xbf16, #tpu.memory_space<vmem>>, %arg2: memref<32x96xbf16, #tpu.memory_space<vmem>>, %arg3: memref<1x96xf32, #tpu.memory_space<vmem>>, %arg4: memref<4x8x32xbf16, #tpu.memory_space<vmem>>, %arg5: memref<1x32xf32, #tpu.memory_space<vmem>>, %arg6: memref<8x32xf32, #tpu.memory_space<vmem>>, %arg7: memref<8x64xf32, #tpu.memory_space<vmem>>) attributes {dimension_semantics = [#tpu.dimension_semantics<parallel>], iteration_bounds = array<i64: 2>, scalar_prefetch = 0 : i64, scratch_operands = 0 : i64, tpu.core_type = #tpu.core_type<tc>, window_params = [{transform_indices = @transform_0, window_bounds = array<i64: 8, 32>}, {pipeline_mode = #tpu.pipeline_mode<synchronous>, transform_indices = @transform_1, window_bounds = array<i64: 32, 96>}, {pipeline_mode = #tpu.pipeline_mode<synchronous>, transform_indices = @transform_2, window_bounds = array<i64: 1, 96>}, {pipeline_mode = #tpu.pipeline_mode<synchronous>, transform_indices = @transform_3, window_bounds = array<i64: 4, 8, 32>}, {pipeline_mode = #tpu.pipeline_mode<synchronous>, transform_indices = @transform_4, window_bounds = array<i64: 1, 32>}, {transform_indices = @transform_5, window_bounds = array<i64: 8, 32>}, {transform_indices = @transform_6, window_bounds = array<i64: 8, 64>}]} {
    %c0 = arith.constant 0 : index
    %c0_0 = arith.constant 0 : index
    %0 = vector.load %arg1[%c0, %c0_0] : memref<8x32xbf16, #tpu.memory_space<vmem>>, vector<8x32xbf16>
    %c0_1 = arith.constant 0 : index
    %c0_2 = arith.constant 0 : index
    %1 = vector.load %arg2[%c0_1, %c0_2] : memref<32x96xbf16, #tpu.memory_space<vmem>>, vector<32x96xbf16>
    %cst = arith.constant dense<0.000000e+00> : vector<8x96xf32>
    %2 = tpu.matmul %0, %1, %cst {dimension_numbers = #tpu.dot_dimension_numbers<[1], [0], [0], [1], [0, 0, 1, 1], [], []>} : vector<8x32xbf16>, vector<32x96xbf16>, vector<8x96xf32> -> vector<8x96xf32>
    %c0_3 = arith.constant 0 : index
    %c0_4 = arith.constant 0 : index
    %3 = vector.load %arg3[%c0_3, %c0_4] : memref<1x96xf32, #tpu.memory_space<vmem>>, vector<1x96xf32>
    %4 = vector.broadcast %3 : vector<1x96xf32> to vector<8x96xf32>
    %5 = arith.addf %2, %4 : vector<8x96xf32>
    %6 = arith.truncf %5 : vector<8x96xf32> to vector<8x96xbf16>
    %7 = vector.extract_strided_slice %6 {offsets = [0, 32], sizes = [8, 64], strides = [1, 1]} : vector<8x96xbf16> to vector<8x64xbf16>
    %8 = arith.extf %7 : vector<8x64xbf16> to vector<8x64xf32>
    %c0_5 = arith.constant 0 : index
    %c0_6 = arith.constant 0 : index
    %9 = vector.load %arg7[%c0_5, %c0_6] : memref<8x64xf32, #tpu.memory_space<vmem>>, vector<8x64xf32>
    tpu.vector_store %arg7[%c0_5, %c0_6], %8 {strides = array<i32>} : memref<8x64xf32, #tpu.memory_space<vmem>>, vector<8x64xf32>,
    %10 = vector.extract_strided_slice %6 {offsets = [0, 0], sizes = [8, 8], strides = [1, 1]} : vector<8x96xbf16> to vector<8x8xbf16>
    %11 = vector.extract_strided_slice %6 {offsets = [0, 8], sizes = [8, 8], strides = [1, 1]} : vector<8x96xbf16> to vector<8x8xbf16>
    %12 = vector.extract_strided_slice %6 {offsets = [0, 16], sizes = [8, 8], strides = [1, 1]} : vector<8x96xbf16> to vector<8x8xbf16>
    %13 = vector.extract_strided_slice %6 {offsets = [0, 24], sizes = [8, 8], strides = [1, 1]} : vector<8x96xbf16> to vector<8x8xbf16>
    %14 = vector.shape_cast %10 : vector<8x8xbf16> to vector<1x8x8xbf16>
    %15 = vector.shape_cast %11 : vector<8x8xbf16> to vector<1x8x8xbf16>
    %16 = vector.shape_cast %12 : vector<8x8xbf16> to vector<1x8x8xbf16>
    %17 = vector.shape_cast %13 : vector<8x8xbf16> to vector<1x8x8xbf16>
    %18 = tpu.concatenate %14, %15, %16, %17 in 0 : vector<1x8x8xbf16>, vector<1x8x8xbf16>, vector<1x8x8xbf16>, vector<1x8x8xbf16> -> vector<4x8x8xbf16>
    %19 = vector.extract_strided_slice %6 {offsets = [0, 32], sizes = [8, 8], strides = [1, 1]} : vector<8x96xbf16> to vector<8x8xbf16>
    %20 = vector.extract_strided_slice %6 {offsets = [0, 40], sizes = [8, 8], strides = [1, 1]} : vector<8x96xbf16> to vector<8x8xbf16>
    %21 = vector.extract_strided_slice %6 {offsets = [0, 48], sizes = [8, 8], strides = [1, 1]} : vector<8x96xbf16> to vector<8x8xbf16>
    %22 = vector.extract_strided_slice %6 {offsets = [0, 56], sizes = [8, 8], strides = [1, 1]} : vector<8x96xbf16> to vector<8x8xbf16>
    %23 = vector.shape_cast %19 : vector<8x8xbf16> to vector<1x8x8xbf16>
    %24 = vector.shape_cast %20 : vector<8x8xbf16> to vector<1x8x8xbf16>
    %25 = vector.shape_cast %21 : vector<8x8xbf16> to vector<1x8x8xbf16>
    %26 = vector.shape_cast %22 : vector<8x8xbf16> to vector<1x8x8xbf16>
    %27 = tpu.concatenate %23, %24, %25, %26 in 0 : vector<1x8x8xbf16>, vector<1x8x8xbf16>, vector<1x8x8xbf16>, vector<1x8x8xbf16> -> vector<4x8x8xbf16>
    %28 = vector.extract_strided_slice %6 {offsets = [0, 64], sizes = [8, 8], strides = [1, 1]} : vector<8x96xbf16> to vector<8x8xbf16>
    %29 = vector.extract_strided_slice %6 {offsets = [0, 72], sizes = [8, 8], strides = [1, 1]} : vector<8x96xbf16> to vector<8x8xbf16>
    %30 = vector.extract_strided_slice %6 {offsets = [0, 80], sizes = [8, 8], strides = [1, 1]} : vector<8x96xbf16> to vector<8x8xbf16>
    %31 = vector.extract_strided_slice %6 {offsets = [0, 88], sizes = [8, 8], strides = [1, 1]} : vector<8x96xbf16> to vector<8x8xbf16>
    %32 = vector.shape_cast %28 : vector<8x8xbf16> to vector<1x8x8xbf16>
    %33 = vector.shape_cast %29 : vector<8x8xbf16> to vector<1x8x8xbf16>
    %34 = vector.shape_cast %30 : vector<8x8xbf16> to vector<1x8x8xbf16>
    %35 = vector.shape_cast %31 : vector<8x8xbf16> to vector<1x8x8xbf16>
    %36 = tpu.concatenate %32, %33, %34, %35 in 0 : vector<1x8x8xbf16>, vector<1x8x8xbf16>, vector<1x8x8xbf16>, vector<1x8x8xbf16> -> vector<4x8x8xbf16>
    %37 = tpu.iota {dimensions = array<i32: 0>} : vector<8x8xi32>
    %38 = tpu.iota {dimensions = array<i32: 1>} : vector<8x8xi32>
    %39 = arith.cmpi sge, %37, %38 : vector<8x8xi32>
    %cst_7 = arith.constant 0.000000e+00 : f32
    %cst_8 = arith.constant -1.000000e+30 : f32
    %40 = vector.broadcast %cst_7 : f32 to vector<8x8xf32>
    %41 = vector.broadcast %cst_8 : f32 to vector<8x8xf32>
    %42 = arith.select %39, %40, %41 : vector<8x8xi1>, vector<8x8xf32>
    "tpu.trace_start"() <{level = 10 : i32, message = "hqd,hkd->hqk"}> : () -> ()
    %cst_9 = arith.constant dense<0.000000e+00> : vector<4x8x8xf32>
    %43 = tpu.matmul %18, %27, %cst_9 {dimension_numbers = #tpu.dot_dimension_numbers<[2], [2], [1], [1], [0, 0, 0, 1, 1, 1], [0], [0]>} : vector<4x8x8xbf16>, vector<4x8x8xbf16>, vector<4x8x8xf32> -> vector<4x8x8xf32>
    "tpu.trace_stop"() : () -> ()
    %44 = vector.shape_cast %42 : vector<8x8xf32> to vector<1x8x8xf32>
    %45 = vector.broadcast %44 : vector<1x8x8xf32> to vector<4x8x8xf32>
    %46 = arith.addf %43, %45 : vector<4x8x8xf32>
    %cst_10 = arith.constant dense<0xFF800000> : vector<4x8xf32>
    %47 = vector.multi_reduction <maximumf>, %46, %cst_10 [2] : vector<4x8x8xf32> to vector<4x8xf32>
    %48 = vector.shape_cast %47 : vector<4x8xf32> to vector<4x8x1xf32>
    %49 = vector.broadcast %48 : vector<4x8x1xf32> to vector<4x8x8xf32>
    %50 = arith.subf %46, %49 : vector<4x8x8xf32>
    %51 = math.exp %50 : vector<4x8x8xf32>
    %cst_11 = arith.constant dense<0.000000e+00> : vector<4x8xf32>
    %52 = vector.multi_reduction <add>, %51, %cst_11 [2] : vector<4x8x8xf32> to vector<4x8xf32>
    %53 = vector.shape_cast %52 : vector<4x8xf32> to vector<4x8x1xf32>
    %54 = tpu.reciprocal %53 {approx = true} : vector<4x8x1xf32> -> vector<4x8x1xf32>
    %55 = arith.truncf %51 : vector<4x8x8xf32> to vector<4x8x8xbf16>
    "tpu.trace_start"() <{level = 10 : i32, message = "hqk,hkd->hqd"}> : () -> ()
    %cst_12 = arith.constant dense<0.000000e+00> : vector<4x8x8xf32>
    %56 = tpu.matmul %55, %36, %cst_12 {dimension_numbers = #tpu.dot_dimension_numbers<[2], [1], [1], [2], [0, 0, 0, 1, 1, 2], [0], [0]>} : vector<4x8x8xbf16>, vector<4x8x8xbf16>, vector<4x8x8xf32> -> vector<4x8x8xf32>
    "tpu.trace_stop"() : () -> ()
    %57 = vector.broadcast %54 : vector<4x8x1xf32> to vector<4x8x8xf32>
    %58 = arith.mulf %56, %57 : vector<4x8x8xf32>
    %59 = arith.truncf %58 : vector<4x8x8xf32> to vector<4x8x8xbf16>
    %cst_13 = arith.constant 0.000000e+00 : f32
    %60 = vector.broadcast %cst_13 : f32 to vector<8x32xf32>
    %61 = vector.extract_strided_slice %59 {offsets = [0, 0, 0], sizes = [1, 8, 8], strides = [1, 1, 1]} : vector<4x8x8xbf16> to vector<1x8x8xbf16>
    %62 = vector.shape_cast %61 : vector<1x8x8xbf16> to vector<8x8xbf16>
    %c0_14 = arith.constant 0 : index
    %c0_15 = arith.constant 0 : index
    %c0_16 = arith.constant 0 : index
    %63 = vector.load %arg4[%c0_14, %c0_15, %c0_16] : memref<4x8x32xbf16, #tpu.memory_space<vmem>>, vector<1x8x32xbf16>
    %64 = vector.shape_cast %63 : vector<1x8x32xbf16> to vector<8x32xbf16>
    %cst_17 = arith.constant dense<0.000000e+00> : vector<8x32xf32>
    %65 = tpu.matmul %62, %64, %cst_17 {dimension_numbers = #tpu.dot_dimension_numbers<[1], [0], [0], [1], [0, 0, 1, 1], [], []>} : vector<8x8xbf16>, vector<8x32xbf16>, vector<8x32xf32> -> vector<8x32xf32>
    %66 = arith.addf %60, %65 : vector<8x32xf32>
    %67 = vector.extract_strided_slice %59 {offsets = [1, 0, 0], sizes = [1, 8, 8], strides = [1, 1, 1]} : vector<4x8x8xbf16> to vector<1x8x8xbf16>
    %68 = vector.shape_cast %67 : vector<1x8x8xbf16> to vector<8x8xbf16>
    %c1 = arith.constant 1 : index
    %c0_18 = arith.constant 0 : index
    %c0_19 = arith.constant 0 : index
    %69 = vector.load %arg4[%c1, %c0_18, %c0_19] : memref<4x8x32xbf16, #tpu.memory_space<vmem>>, vector<1x8x32xbf16>
    %70 = vector.shape_cast %69 : vector<1x8x32xbf16> to vector<8x32xbf16>
    %cst_20 = arith.constant dense<0.000000e+00> : vector<8x32xf32>
    %71 = tpu.matmul %68, %70, %cst_20 {dimension_numbers = #tpu.dot_dimension_numbers<[1], [0], [0], [1], [0, 0, 1, 1], [], []>} : vector<8x8xbf16>, vector<8x32xbf16>, vector<8x32xf32> -> vector<8x32xf32>
    %72 = arith.addf %66, %71 : vector<8x32xf32>
    %73 = vector.extract_strided_slice %59 {offsets = [2, 0, 0], sizes = [1, 8, 8], strides = [1, 1, 1]} : vector<4x8x8xbf16> to vector<1x8x8xbf16>
    %74 = vector.shape_cast %73 : vector<1x8x8xbf16> to vector<8x8xbf16>
    %c2 = arith.constant 2 : index
    %c0_21 = arith.constant 0 : index
    %c0_22 = arith.constant 0 : index
    %75 = vector.load %arg4[%c2, %c0_21, %c0_22] : memref<4x8x32xbf16, #tpu.memory_space<vmem>>, vector<1x8x32xbf16>
    %76 = vector.shape_cast %75 : vector<1x8x32xbf16> to vector<8x32xbf16>
    %cst_23 = arith.constant dense<0.000000e+00> : vector<8x32xf32>
    %77 = tpu.matmul %74, %76, %cst_23 {dimension_numbers = #tpu.dot_dimension_numbers<[1], [0], [0], [1], [0, 0, 1, 1], [], []>} : vector<8x8xbf16>, vector<8x32xbf16>, vector<8x32xf32> -> vector<8x32xf32>
    %78 = arith.addf %72, %77 : vector<8x32xf32>
    %79 = vector.extract_strided_slice %59 {offsets = [3, 0, 0], sizes = [1, 8, 8], strides = [1, 1, 1]} : vector<4x8x8xbf16> to vector<1x8x8xbf16>
    %80 = vector.shape_cast %79 : vector<1x8x8xbf16> to vector<8x8xbf16>
    %c3 = arith.constant 3 : index
    %c0_24 = arith.constant 0 : index
    %c0_25 = arith.constant 0 : index
    %81 = vector.load %arg4[%c3, %c0_24, %c0_25] : memref<4x8x32xbf16, #tpu.memory_space<vmem>>, vector<1x8x32xbf16>
    %82 = vector.shape_cast %81 : vector<1x8x32xbf16> to vector<8x32xbf16>
    %cst_26 = arith.constant dense<0.000000e+00> : vector<8x32xf32>
    %83 = tpu.matmul %80, %82, %cst_26 {dimension_numbers = #tpu.dot_dimension_numbers<[1], [0], [0], [1], [0, 0, 1, 1], [], []>} : vector<8x8xbf16>, vector<8x32xbf16>, vector<8x32xf32> -> vector<8x32xf32>
    %84 = arith.addf %78, %83 : vector<8x32xf32>
    %c0_27 = arith.constant 0 : index
    %c0_28 = arith.constant 0 : index
    %85 = vector.load %arg5[%c0_27, %c0_28] : memref<1x32xf32, #tpu.memory_space<vmem>>, vector<1x32xf32>
    %86 = vector.broadcast %85 : vector<1x32xf32> to vector<8x32xf32>
    %87 = arith.addf %84, %86 : vector<8x32xf32>
    %c0_29 = arith.constant 0 : index
    %c0_30 = arith.constant 0 : index
    %88 = vector.load %arg6[%c0_29, %c0_30] : memref<8x32xf32, #tpu.memory_space<vmem>>, vector<8x32xf32>
    tpu.vector_store %arg6[%c0_29, %c0_30], %87 {strides = array<i32>} : memref<8x32xf32, #tpu.memory_space<vmem>>, vector<8x32xf32>,
    return
  }
  func.func @transform_0(%arg0: i32) -> (i32, i32) {
    %c0_i32 = arith.constant 0 : i32
    %c0_i32_0 = arith.constant 0 : i32
    return %arg0, %c0_i32 : i32, i32
  }
  func.func @transform_1(%arg0: i32) -> (i32, i32) {
    %c0_i32 = arith.constant 0 : i32
    %c0_i32_0 = arith.constant 0 : i32
    %c0_i32_1 = arith.constant 0 : i32
    return %c0_i32, %c0_i32_0 : i32, i32
  }
  func.func @transform_2(%arg0: i32) -> (i32, i32) {
    %c0_i32 = arith.constant 0 : i32
    %c0_i32_0 = arith.constant 0 : i32
    %c0_i32_1 = arith.constant 0 : i32
    return %c0_i32, %c0_i32_0 : i32, i32
  }
  func.func @transform_3(%arg0: i32) -> (i32, i32, i32) {
    %c0_i32 = arith.constant 0 : i32
    %c0_i32_0 = arith.constant 0 : i32
    %c0_i32_1 = arith.constant 0 : i32
    %c0_i32_2 = arith.constant 0 : i32
    return %c0_i32, %c0_i32_0, %c0_i32_1 : i32, i32, i32
  }
  func.func @transform_4(%arg0: i32) -> (i32, i32) {
    %c0_i32 = arith.constant 0 : i32
    %c0_i32_0 = arith.constant 0 : i32
    %c0_i32_1 = arith.constant 0 : i32
    return %c0_i32, %c0_i32_0 : i32, i32
  }
  func.func @transform_5(%arg0: i32) -> (i32, i32) {
    %c0_i32 = arith.constant 0 : i32
    %c0_i32_0 = arith.constant 0 : i32
    return %arg0, %c0_i32 : i32, i32
  }
  func.func @transform_6(%arg0: i32) -> (i32, i32) {
    %c0_i32 = arith.constant 0 : i32
    %c0_i32_0 = arith.constant 0 : i32
    return %arg0, %c0_i32 : i32, i32
  }
}

</mosaic_0001>

<bundles_post_ra>
// kernel: tpu_custom_call.1
= control target key start
LH: loop header
LB: loop body
LE: loop exit
PB: predicated region body
PF: predicated region fallthrough
CT: control target
= control target key end

     0   :  { %s1451_s0 = inlined_call_operand.hbm [shape: bf16[16,32], index: 0, kind: input, shape index: {}]   ;;  %s1452_s1 = inlined_call_operand.hbm [shape: bf16[32,96], index: 1, kind: input, shape index: {}]   ;;  %s1453_s2 = inlined_call_operand.vmem [shape: f32[1,96], index: 2, kind: input, shape index: {}]   ;;  %s1454_s3 = inlined_call_operand.hbm [shape: bf16[4,8,32], index: 3, kind: input, shape index: {}]   ;;  %s1455_s4 = inlined_call_operand.vmem [shape: f32[1,32], index: 4, kind: input, shape index: {}]   ;;  %s1456_s5 = inlined_call_operand.hbm [shape: f32[16,32], index: 5, kind: output, shape index: {0}]   ;;  %s1457_s6 = inlined_call_operand.hbm [shape: f32[16,64], index: 6, kind: output, shape index: {1}]  }
   0x1   :  { %1458 = sst [smem:[#allocation15_spill]] %s1452_s1 }
   0x2   :  { %12 = vsyncpa [#allocation3], 0 }
   0x3   :  { %14 = vsyncpa [#allocation3 + $0x1], 0 }
   0x4   :  { %15 = vsyncpa [#allocation6], 0 }
   0x5   :  { %16 = vsyncpa [#allocation4], 0 }
   0x6   :  { %18 = vsyncpa [#allocation4 + $0x1], 0 }
   0x7   :  { %19 = vsyncpa [#allocation10], 0 }
   0x8   :  { %21 = vsyncpa [#allocation10 + $0x1], 0  ;;  %s1230_s21 = smov 0   ;;  %s1232_s22 = smov 0  }
   0x9   :  { %s1234_s23 = smov 0   ;;  %s1236_s24 = smov 0  }
   0xa LB: > { %s1459_s1 = sld [smem:[#allocation15_spill]]  ;;  %s1254_s28 = sadd.s32 4294967295, %s1183_s24   ;;  %s1183_s24 = sphi %s1236_s24, %s1470_s24   ;;  %s1179_s23 = sphi %s1234_s23, %s1469_s23   ;;  %s1175_s22 = sphi %s1232_s22, %s1468_s22   ;;  %s1171_s21 = sphi %s1230_s21, %s1467_s21  }
   0xb   : > { %p852_p0 = scmp.ge.s32.totalorder %s1183_s24, 1  ;;  %p48_p1 = scmp.eq.s32.totalorder %s1254_s28, 0 }
   0xc   : > { %p194_p2 = scmp.lt.s32.totalorder %s1183_s24, 3  ;;  %s1185_s30 = smov [#allocation5]  }
   0xd   : > { %s207_s7 = sshll.u32 %s1185_s30, 4  ;;  %s222_s10 = sshll.u32 %s1454_s3, 4  ;;  %s208_s7 = int_to_ptr.vmem [resolvable:$true] %s207_s7  ;;  %s223_s10 = int_to_ptr.hbm [resolvable:$true] %s222_s10 }
   0xe   : > { %p1259_p3 = pnand %p852_p0, %p194_p2  ;;  %s1186_s11 = smov [#allocation7]  }
   0xf   : > { %s224_s12 = sshll.u32 %s1186_s11, 4  ;;  %s1187_s13 = smov 64   ;;  %s225_s12 = int_to_ptr.vmem [resolvable:$true] %s224_s12 }
  0x10   : > { %s205_s27 = sshll.u32 %s1459_s1, 4  ;;  %p907_p4 = pneg %p1259_p3  ;;  %s206_s27 = int_to_ptr.hbm [resolvable:$true] %s205_s27 }
  0x11   : > { %s1188_s14 = smov 4   ;;  %s851_s15 = sadd.s32 4294967294, %s1183_s24  }
  0x12   : > { %p908_p6 = pnand %p907_p4, %p48_p1  ;;  %s1273_s16 = sadd.s32 1, %s1183_s24  }
  0x13   : > { %s31_s17 = ssub.s32 %s1183_s24, %s1273_s16  ;;  %s34_s18 = sadd.s32 1, %s1179_s23 }
  0x14   : > { %910 = dma.hbm_to_vmem [thread:$0]  (!%p908_p6), %s206_s27, 256, %s208_s7, [#allocation6], %s1187_s13, %s1187_s13, %s1188_s14  }
  0x15   : > { %913 = dma.hbm_to_vmem [thread:$0]  (!%p908_p6), %s223_s10, 256, %s225_s12, [#allocation6], %s1187_s13, %s1187_s13, %s1188_s14  }
  0x16   : > { %p32_p7 = scmp.eq.s32.totalorder %s31_s17, 0  ;;  %p41_p8 = scmp.ne.s32.totalorder %s1179_s23, %s1175_s22 }
  0x17   : > { %p42_p9 = scmp.eq.s32.totalorder %s1183_s24, 0  ;;  %p47_p10 = scmp.ne.s32.totalorder %s1175_s22, %s1171_s21 }
  0x18   : > { %s1284_s19 = scalar_select %p32_p7, %s1179_s23, %s34_s18  }
  0x19   : > { %p1286_p11 = por %p42_p9, %p41_p8  ;;  %p1292_p12 = por %p48_p1, %p47_p10 }
  0x1a   : > { %p155_p13 = scmp.eq.s32.totalorder %s1254_s28, 1  ;;  %p161_p0 = scmp.eq.s32.totalorder %s851_s15, 1 }
  0x1b   : > { %p927_p2 = scmp.lt.s32.totalorder %s1183_s24, 2  ;;  %s241_s26 = sand.u32 1, %s1179_s23  }
  0x1c   : > { %p1299_p4 = por %p155_p13, %p41_p8  ;;  %p1303_p6 = por %p161_p0, %p47_p10 }
  0x1d   : > { %s856_s7 = sshll.u32 %s241_s26, 2  ;;  %s857_s8 = sshll.u32 %s1183_s24, 2 }
  0x1e   : > { %s249_s11 = scalar_lea.hbm %s1451_s0, %s857_s8  ;;  %s245_s12 = scalar_lea.vmem [#allocation2], %s856_s7 }
  0x1f   : > { %s253_s13 = sshll.u32 %s245_s12, 4  ;;  %s251_s14 = sshll.u32 %s249_s11, 4  ;;  %s254_s13 = int_to_ptr.vmem [resolvable:$true] %s253_s13  ;;  %s252_s14 = int_to_ptr.hbm [resolvable:$true] %s251_s14 }
  0x20   : > { %p1313_p7 = pnand %p927_p2, %p1286_p11  ;;  %s242_s17 = scalar_lea.sflag [#allocation3], %s241_s26 }
  0x21   : > { %s1051_s18 = sshra.s32 %s252_s14, 4  ;;  %s1058_s9 = scalar_lea.hbm %s1451_s0, 8  ;;  %s1052_s18 = int_to_ptr.hbm [resolvable:$true] %s1051_s18 }
  0x22   : > { %s1053_s1 = scalar_lea.hbm %s1052_s18, 4  ;;  %p1055_p9 = pneg %p1313_p7 }
  0x23   : > { %p1054_p8 = scmp.ne.s32.totalorder %s1052_s18, %s1053_s1  ;;  %p1059_p11 = scmp.lt.s32.totalorder %s1052_s18, %s1451_s0 }
  0x24   : > { %p1060_p0 = scmp.lt.s32.totalorder %s1058_s9, %s1053_s1 }
  0x25   : > { %p1056_p10 = pnand %p1055_p9, %p1054_p8 }
  0x26   : > { %p1061_p2 = por %p1060_p0, %p1059_p11 }
  0x27   : > { %p1057_p13 = pneg %p1056_p10 }
  0x29   : > { %p1062_p5 = pnand %p1061_p2, %p1057_p13 }
  0x2b   : > { %1065 = shalt.err (!%p1062_p5)
}
  0x2c   : > { %917 = dma.hbm_to_vmem [thread:$0]  (!%p1313_p7), %s252_s14, 64, %s254_s13, %s242_s17  }
  0x2d   : > { %262 = sbr.rel (%p1259_p3) target bundleno = 987 (0x3db), region = 40  ;;  %s1330_s26 = sand.u32 (!%p1259_p3), 1, %s1175_s22  }
  0x2e   : > { %s859_s11 = sshll.u32 (!%p1259_p3), %s1330_s26, 2  ;;  %s265_s12 = scalar_lea.sflag (!%p1259_p3), [#allocation3], %s1330_s26 }
  0x2f   : > { %s268_s7 = scalar_lea.vmem (!%p1259_p3), [#allocation2], %s859_s11 }
  0x32   : > { %1154 = dma.done.wait (%p1292_p12), %s265_s12, 64  }
  0x33   : > { %1156 = vsyncadd (%p1292_p12), %s265_s12, 4294967232 }
  0x34   : > { %1158 = dma.done.wait (%p48_p1), [#allocation6], 512  }
  0x35   : > { %1160 = vsyncadd (%p48_p1), [#allocation6], 4294966784  ;;  %v892_v0 = vld [vmem:[#allocation5 + $0x8] sm:$0xff]  ;;  %v891_v1 = vld [vmem:[#allocation5] sm:$0xff]  ;;  %vm335_vm0 = vcmask 261120   ;;  %s1189_s25 = smov 104   ;;  %v367_v29 = vlaneseq }
  0x36   : > { %345 = vmatpush.bf16.msra.mxu0 %v892_v0  ;;  %v314_v2 = vld [vmem:[%s268_s7] sm:$0xf]  ;;  %s1190_s13 = smov 112   ;;  %s1191_s14 = smov 120   ;;  %vm377_vm1 = vcmask 64512   ;;  %vm515_vm2 = vcmask 1043456  }
  0x37   : > { %v973_v3 = vld [vmem:[%s1453_s2] ss:$0 sm:$0xff]  ;;  %s1192_s15 = smov 96   ;;  %s1193_s17 = smov 64   ;;  %v368_v30 = vshrl.u32 %v367_v29, 7  ;;  %v370_v31 = vand.u32 127, %v367_v29 }
  0x38   : > { %v1194_v32 = vmov -1e+30   ;;  %s862_s18 = sshll.u32 %s1330_s26, 3  ;;  %vm358_vm4 = vcmask 523264   ;;  %s887_s9 = sshll.u32 %s1254_s28, 3 }
  0x39   : > { %vm371_vm3 = vcmp.ge.s32.totalorder %v368_v30, %v370_v31  ;;  %s312_s8 = scalar_lea.vmem [#allocation9], %s862_s18  ;;  %s724_s11 = scalar_lea.hbm %s1457_s6, %s887_s9 }
  0x3a   : > { %346 = vmatpush.bf16.msra.mxu0 %v891_v1  ;;  %v372_v33 = vsel %vm371_vm3, 0.0, %v1194_v32  ;;  %s726_s12 = sshll.u32 %s312_s8, 4  ;;  %s728_s7 = sshll.u32 %s724_s11, 4  ;;  %s727_s12 = int_to_ptr.vmem [resolvable:$true] %s726_s12  ;;  %s729_s7 = int_to_ptr.hbm [resolvable:$true] %s728_s7 }
  0x3b   : > { %s700_s1 = scalar_lea.sflag [#allocation10], %s1330_s26  ;;  %s1095_s29 = sshra.s32 %s729_s7, 4  ;;  %s1096_s29 = int_to_ptr.hbm [resolvable:$true] %s1095_s29 }
  0x3c   : > { %s1101_s28 = scalar_lea.hbm %s1457_s6, 16  ;;  %p1102_p12 = scmp.lt.s32.totalorder %s1096_s29, %s1457_s6 }
  0x3d   : > { %872 = vmatmul.msk.bf16.vlgmr.msra.gmra.mxu0 %vm335_vm0, %v314_v2 }
  0xba   : > { %v348_v4 = vpop.f32.mrf.mxu0 }
  0xbb   : > { %v349_v5 = vadd.f32 %v973_v3, %v348_v4 }
  0xbd   : > { %v1346_v6 = vpack.c.bf16 %v349_v5, %v349_v5 }
  0xbf   : > { %365 = vrot.lane.b32.xlu1 %v1346_v6, %s1189_s25  ;;  %363 = vrot.lane.b32.xlu0 %v1346_v6, %s1190_s13  ;;  %v373_v17 = vunpack.c.l.b16 %v1346_v6  ;;  %s1097_s25 = scalar_lea.hbm %s1096_s29, 8 }
  0xc0   : > { %p1098_p1 = scmp.ne.s32.totalorder %s1096_s29, %s1097_s25  ;;  %p1103_p7 = scmp.lt.s32.totalorder %s1101_s28, %s1097_s25 }
  0xc1   : > { %v374_v18 = vpack.c.b16 %v373_v17, %v373_v17  ;;  %v353_v17 = vunpack.c.l.bf16 %v1346_v6 }
  0xc2   : > { %v350_v7 = vpop.f32.mrf.mxu0  ;;  %p1099_p3 = pnand %p1098_p1, %p1299_p4  ;;  %p1104_p8 = por %p1103_p7, %p1102_p12 }
  0xc4   : > { %p1100_p5 = pneg %p1099_p3 }
  0xc6   : > { %p1105_p9 = pnand %p1104_p8, %p1100_p5 }
  0xc7   : > { %361 = vrot.lane.b32.xlu0 %v1346_v6, %s1191_s14 }
 0x131   : > { %v366_v8 = vpop.permute.xlu1 %365  ;;  %v364_v9 = vpop.permute.xlu0 %363 }
 0x132   : > { %v443_v10 = vunpack.c.l.b16 %v366_v8  ;;  %v420_v11 = vunpack.c.l.b16 %v364_v9 }
 0x134   : > { %v444_v12 = vpack.c.b16 %v443_v10, %v443_v10  ;;  %v421_v13 = vpack.c.b16 %v420_v11, %v420_v11 }
 0x136   : > { %445 = vrot.lane.b32.xlu0 %v444_v12, %s1192_s15  ;;  %422 = vrot.lane.b32.xlu1 %v421_v13, %s1192_s15 }
 0x139   : > { %v362_v14 = vpop.permute.xlu0 %361 }
 0x13a   : > { %v397_v15 = vunpack.c.l.b16 %v362_v14 }
 0x13c   : > { %v398_v16 = vpack.c.b16 %v397_v15, %v397_v15 }
 0x13e   : > { %399 = vrot.lane.b32.xlu2 %v398_v16, %s1192_s15 }
 0x146   : > { %375 = vrot.lane.b32.xlu2 %v374_v18, %s1192_s15 }
 0x14e   : > { %553 = vrot.lane.b32.xlu2 %v421_v13, %s1193_s17 }
 0x198   : > { %v400_v19 = vpop.permute.xlu2 %399 }
 0x199   : > { %v405_v20 = vsel %vm377_vm1, %v400_v19, 0  ;;  %v667_v19 = vld [vmem:[#allocation7 + $0xc] sm:$0xf] }
 0x19a   : > { %414 = vmatpush.bf16.xpose.msra.mxu2 %v405_v20 }
 0x1a0   : > { %v376_v21 = vpop.permute.xlu2 %375 }
 0x1a1   : > { %874 = vmatmul.msk.bf16.vlgmr.msra.gmra.mxu2 %vm377_vm1, %v362_v14  ;;  %v382_v22 = vsel %vm377_vm1, %v376_v21, 0  ;;  %v672_v21 = vsel %vm515_vm2, %v667_v19, 0 }
 0x1a2   : > { %391 = vmatpush.bf16.xpose.msra.mxu1 %v382_v22 }
 0x1a8   : > { %v423_v23 = vpop.permute.xlu1 %422  ;;  %v446_v24 = vpop.permute.xlu0 %445 }
 0x1a9   : > { %v554_v25 = vpop.permute.xlu2 %553  ;;  %873 = vmatmul.msk.bf16.vlgmr.msra.gmra.mxu1 %vm377_vm1, %v1346_v6  ;;  %v428_v26 = vsel %vm377_vm1, %v423_v23, 0  ;;  %v451_v27 = vsel %vm377_vm1, %v446_v24, 0  ;;  %v645_v23 = vld [vmem:[#allocation7 + $0x8] sm:$0xf] }
 0x1aa   : > { %437 = vmatpush.bf16.xpose.msra.mxu3 %v428_v26  ;;  %460 = vmatpush.bf16.xpose.msrb.mxu0 %v451_v27  ;;  %v559_v28 = vsel %vm515_vm2, %v554_v25, 0  ;;  %v650_v24 = vsel %vm515_vm2, %v645_v23, 0  ;;  %v605_v26 = vld [vmem:[#allocation7 + $0x4] sm:$0xf] }
 0x1b1   : > { %875 = vmatmul.msk.bf16.vlgmr.msra.gmra.mxu3 %vm377_vm1, %v364_v9  ;;  %876 = vmatmul.msk.bf16.vlgmr.msrb.gmra.mxu0 %vm377_vm1, %v366_v8 }
 0x1b2   : > { %568 = vmatpush.bf16.msrb.mxu3 %v559_v28  ;;  %v610_v28 = vsel %vm515_vm2, %v605_v26, 0 }
 0x1b6   : > { %659 = vmatpush.bf16.msra.mxu3 %v650_v24 }
 0x224   : > { %v416_v34 = vpop.f32.mrf.mxu2 }
 0x225   : > { %v417_v35 = vadd.f32 %v416_v34, %v372_v33 }
 0x226   : > { %v393_v36 = vpop.f32.mrf.mxu1 }
 0x227   : > { %v394_v37 = vadd.f32 %v393_v36, %v372_v33  ;;  %v469_v38 = vsel %vm377_vm1, %v417_v35, -inf }
 0x228   : > { %470 = vmax.xlane.f32.xlu0 %v469_v38 }
 0x229   : > { %v466_v39 = vsel %vm377_vm1, %v394_v37, -inf }
 0x22a   : > { %467 = vmax.xlane.f32.xlu2 %v466_v39 }
 0x22c   : > { %v418_v40 = vpop.f32.mrf.mxu2 }
 0x22e   : > { %v395_v41 = vpop.f32.mrf.mxu1  ;;  %v462_v42 = vpop.f32.mrf.mxu0 }
 0x22f   : > { %v463_v43 = vadd.f32 %v462_v42, %v372_v33 }
 0x231   : > { %v475_v44 = vsel %vm377_vm1, %v463_v43, -inf }
 0x232   : > { %476 = vmax.xlane.f32.xlu1 %v475_v44 }
 0x234   : > { %v439_v45 = vpop.f32.mrf.mxu3 }
 0x235   : > { %v440_v46 = vadd.f32 %v439_v45, %v372_v33 }
 0x236   : > { %v464_v47 = vpop.f32.mrf.mxu0 }
 0x237   : > { %v472_v48 = vsel %vm377_vm1, %v440_v46, -inf }
 0x23a   : > { %473 = vmax.xlane.f32.xlu1 %v472_v48 }
 0x23c   : > { %v441_v49 = vpop.f32.mrf.mxu3  ;;  %510 = vrot.lane.b32.xlu0 %v374_v18, %s1193_s17  ;;  %v603_v18 = vld [vmem:[#allocation7] sm:$0xf] }
 0x23d   : > { %v629_v20 = vsel %vm515_vm2, %v603_v18, 0 }
 0x242   : > { %574 = vrot.lane.b32.xlu2 %v444_v12, %s1193_s17 }
 0x253   : > { %532 = vrot.lane.b32.xlu1 %v398_v16, %s1193_s17 }
 0x29b   : > { %v471_v50 = vpop.xlane.xlu0 %470 }
 0x29c   : > { %v479_v51 = vsub.f32 %v417_v35, %v471_v50 }
 0x29d   : > { %v468_v52 = vpop.xlane.xlu2 %467 }
 0x29e   : > { %v484_v53 = vmul.f32 1.442695, %v479_v51  ;;  %v478_v54 = vsub.f32 %v394_v37, %v468_v52 }
 0x2a0   : > { %975 = vpow2.f32 %v484_v53  ;;  %v482_v55 = vmul.f32 1.442695, %v478_v54 }
 0x2a2   : > { %977 = vpow2.f32 %v482_v55 }
 0x2a5   : > { %v477_v56 = vpop.xlane.xlu1 %476  ;;  %v575_v57 = vpop.permute.xlu2 %574 }
 0x2a6   : > { %v976_v58 = vpop.eup %975  ;;  %v481_v59 = vsub.f32 %v463_v43, %v477_v56  ;;  %v580_v60 = vsel %vm515_vm2, %v575_v57, 0 }
 0x2a7   : > { %589 = vmatpush.bf16.msra.mxu0 %v580_v60  ;;  %v493_v61 = vsel %vm377_vm1, %v976_v58, 0.0  ;;  %v507_v16 = vpack.c.bf16 %v976_v58, %v976_v58 }
 0x2a8   : > { %v978_v62 = vpop.eup %977  ;;  %v488_v63 = vmul.f32 1.442695, %v481_v59  ;;  %494 = vadd.xlane.f32.xlu1 %v493_v61 }
 0x2a9   : > { %v490_v0 = vsel %vm377_vm1, %v978_v62, 0.0  ;;  %v506_v10 = vpack.c.bf16 %v978_v62, %v978_v62 }
 0x2aa   : > { %979 = vpow2.f32 %v488_v63  ;;  %491 = vadd.xlane.f32.xlu0 %v490_v0 }
 0x2ab   : > { %681 = vmatpush.bf16.msrb.mxu0 %v672_v21 }
 0x2ad   : > { %v474_v1 = vpop.xlane.xlu1 %473 }
 0x2ae   : > { %v480_v2 = vsub.f32 %v440_v46, %v474_v1  ;;  %v511_v3 = vpop.permute.xlu0 %510 }
 0x2af   : > { %v517_v4 = vsel %vm515_vm2, %v511_v3, 0 }
 0x2b0   : > { %v980_v5 = vpop.eup %979  ;;  %v486_v7 = vmul.f32 1.442695, %v480_v2  ;;  %526 = vmatpush.bf16.msrb.mxu1 %v517_v4 }
 0x2b1   : > { %v509_v8 = vpack.c.bf16 %v980_v5, %v980_v5  ;;  %v499_v9 = vsel %vm377_vm1, %v980_v5, 0.0 }
 0x2b2   : > { %981 = vpow2.f32 %v486_v7  ;;  %500 = vadd.xlane.f32.xlu0 %v499_v9 }
 0x2b3   : > { %877 = vmatmul.msk.bf16.vlgmr.msrb.gmra.mxu1 %vm377_vm1, %v506_v10  ;;  %880 = vmatmul.msk.bf16.vlgmr.msra.gmra.mxu0 %vm377_vm1, %v509_v8 }
 0x2b4   : > { %619 = vmatpush.bf16.msra.mxu1 %v610_v28 }
 0x2b8   : > { %v982_v11 = vpop.eup %981 }
 0x2b9   : > { %v496_v12 = vsel %vm377_vm1, %v982_v11, 0.0  ;;  %v508_v13 = vpack.c.bf16 %v982_v11, %v982_v11 }
 0x2ba   : > { %497 = vadd.xlane.f32.xlu2 %v496_v12 }
 0x2bb   : > { %879 = vmatmul.msk.bf16.vlgmr.msrb.gmra.mxu3 %vm377_vm1, %v508_v13 }
 0x2c5   : > { %v533_v14 = vpop.permute.xlu1 %532 }
 0x2c6   : > { %v538_v15 = vsel %vm515_vm2, %v533_v14, 0 }
 0x2c7   : > { %547 = vmatpush.bf16.msrb.mxu2 %v538_v15 }
 0x2ca   : > { %878 = vmatmul.msk.bf16.vlgmr.msrb.gmra.mxu2 %vm377_vm1, %v507_v16 }
 0x2cb   : > { %638 = vmatpush.bf16.msra.mxu2 %v629_v20 }
 0x2d2   : > { %355 = vrot.lane.b32.xlu2 %v353_v17, %s1192_s15 }
 0x31b   : > { %v495_v43 = vpop.xlane.xlu1 %494 }
 0x31d   : > { %v492_v22 = vpop.xlane.xlu0 %491 }
 0x31e   : > { %983 = vrcp.f32 %v492_v22 }
 0x324   : > { %v984_v27 = vpop.eup %983 }
 0x325   : > { %v501_v25 = vpop.xlane.xlu0 %500 }
 0x326   : > { %985 = vrcp.f32 %v501_v25 }
 0x32c   : > { %v986_v29 = vpop.eup %985 }
 0x32d   : > { %v498_v6 = vpop.xlane.xlu2 %497 }
 0x32e   : > { %987 = vrcp.f32 %v498_v6 }
 0x32f   : > { %989 = vrcp.f32 %v495_v43 }
 0x330   : > { %v528_v30 = vpop.f32.mrf.mxu1  ;;  %v591_v31 = vpop.f32.mrf.mxu0 }
 0x331   : > { %v595_v32 = vmul.f32 %v984_v27, %v528_v30  ;;  %v598_v33 = vmul.f32 %v986_v29, %v591_v31 }
 0x333   : > { %v599_v34 = vpack.c.bf16 %v595_v32, %v595_v32  ;;  %v602_v35 = vpack.c.bf16 %v598_v33, %v598_v33 }
 0x334   : > { %v988_v39 = vpop.eup %987 }
 0x335   : > { %882 = vmatmul.msk.bf16.vlgmr.msra.gmra.mxu2 %vm377_vm1, %v599_v34  ;;  %884 = vmatmul.msk.bf16.vlgmr.msrb.gmra.mxu0 %vm377_vm1, %v602_v35  ;;  %v356_v36 = vpop.permute.xlu2 %355  ;;  %v990_v45 = vpop.eup %989 }
 0x336   : > { %359 = vst.msk [vmem:[%s312_s8] sm:$0xff] %vm358_vm4, %v356_v36 }
 0x338   : > { %v530_v37 = vpop.f32.mrf.mxu1  ;;  %v593_v38 = vpop.f32.mrf.mxu0 }
 0x33e   : > { %v570_v40 = vpop.f32.mrf.mxu3 }
 0x33f   : > { %v597_v41 = vmul.f32 %v988_v39, %v570_v40 }
 0x341   : > { %v601_v42 = vpack.c.bf16 %v597_v41, %v597_v41 }
 0x343   : > { %883 = vmatmul.msk.bf16.vlgmr.msra.gmra.mxu3 %vm377_vm1, %v601_v42 }
 0x346   : > { %v572_v44 = vpop.f32.mrf.mxu3 }
 0x34d   : > { %v549_v46 = vpop.f32.mrf.mxu2 }
 0x34e   : > { %v596_v47 = vmul.f32 %v990_v45, %v549_v46 }
 0x350   : > { %v600_v48 = vpack.c.bf16 %v596_v47, %v596_v47 }
 0x352   : > { %881 = vmatmul.msk.bf16.vlgmr.msra.gmra.mxu1 %vm377_vm1, %v600_v48 }
 0x355   : > { %v551_v49 = vpop.f32.mrf.mxu2 }
 0x356   : > { %1108 = shalt.err (!%p1105_p9)
}
 0x357   : > { %904 = dma.vmem_to_hbm [thread:$0]  (%p1299_p4), %s727_s12, 128, %s729_s7, %s700_s1   ;;  %v974_v59 = vld [vmem:[%s1455_s4] ss:$0 sm:$0xff] }
 0x358   : > { %s710_s20 = scalar_lea.hbm %s1456_s5, %s887_s9  ;;  %s305_s12 = scalar_lea.vmem [#allocation8], %s862_s18 }
 0x359   : > { %s712_s7 = sshll.u32 %s305_s12, 4  ;;  %s714_s1 = sshll.u32 %s710_s20, 4  ;;  %s713_s7 = int_to_ptr.vmem [resolvable:$true] %s712_s7  ;;  %s715_s1 = int_to_ptr.hbm [resolvable:$true] %s714_s1 }
 0x35a   : > { %s695_s25 = scalar_lea.sflag [#allocation4], %s1330_s26  ;;  %s1123_s13 = sshra.s32 %s715_s1, 4  ;;  %s1124_s13 = int_to_ptr.hbm [resolvable:$true] %s1123_s13 }
 0x35b   : > { %s1125_s9 = scalar_lea.hbm %s1124_s13, 8  ;;  %s1129_s18 = scalar_lea.hbm %s1456_s5, 16 }
 0x35c   : > { %p1126_p10 = scmp.ne.s32.totalorder %s1124_s13, %s1125_s9  ;;  %p1130_p0 = scmp.lt.s32.totalorder %s1124_s13, %s1456_s5 }
 0x35d   : > { %p1131_p2 = scmp.lt.s32.totalorder %s1129_s18, %s1125_s9 }
 0x35e   : > { %p1127_p13 = pnand %p1126_p10, %p1299_p4 }
 0x35f   : > { %p1132_p1 = por %p1131_p2, %p1130_p0 }
 0x360   : > { %p1128_p11 = pneg %p1127_p13 }
 0x362   : > { %p1133_p3 = pnand %p1132_p1, %p1128_p11 }
 0x3b2   : > { %v683_v50 = vpop.f32.mrf.mxu0 }
 0x3b8   : > { %v640_v51 = vpop.f32.mrf.mxu2 }
 0x3ba   : > { %v685_v52 = vpop.f32.mrf.mxu0 }
 0x3c0   : > { %v642_v53 = vpop.f32.mrf.mxu2 }
 0x3c6   : > { %v661_v54 = vpop.f32.mrf.mxu3 }
 0x3ce   : > { %v663_v55 = vpop.f32.mrf.mxu3 }
 0x3cf   : > { %v621_v56 = vpop.f32.mrf.mxu1 }
 0x3d0   : > { %v641_v57 = vadd.f32 %v640_v51, %v621_v56 }
 0x3d2   : > { %v665_v58 = vadd.f32 %v661_v54, %v641_v57 }
 0x3d4   : > { %v687_v60 = vadd.f32 %v683_v50, %v665_v58 }
 0x3d6   : > { %v692_v61 = vadd.f32 %v974_v59, %v687_v60 }
 0x3d7   : > { %v623_v62 = vpop.f32.mrf.mxu1 }
 0x3d8   : > { %693 = vst.msk [vmem:[%s305_s12] sm:$0xff] %vm335_vm0, %v692_v61 }
 0x3d9   : > { %1136 = shalt.err (!%p1133_p3)
}
 0x3da   : > { %903 = dma.vmem_to_hbm [thread:$0]  (%p1299_p4), %s713_s7, 128, %s715_s1, %s695_s25  }
 0x3db PF: > { %s740_s26 = sand.u32 1, %s1171_s21   ;;  %p1466_p5 = scmp.ge.s32.totalorder %s1183_s24, 2 }
 0x3dc   : > { %s741_s8 = scalar_lea.sflag [#allocation4], %s740_s26 }
 0x3dd   : > { %p919_p12 = pnand %p1466_p5, %p1303_p6 }
 0x3df   : > { %p920_p7 = pneg %p919_p12 }
 0x3e1   : > { %1162 = dma.done.wait (%p920_p7), %s741_s8, 128  }
 0x3e2   : > { %1164 = vsyncadd (%p920_p7), %s741_s8, 4294967168  ;;  %s751_s10 = scalar_lea.sflag [#allocation10], %s740_s26 }
 0x3e3   : > { %1166 = dma.done.wait (%p920_p7), %s751_s10, 128  }
 0x3e4   : > { %1168 = vsyncadd (%p920_p7), %s751_s10, 4294967168  ;;  %p24_p4 = scmp.ge.s32.totalorder %s1273_s16, 4   ;;  %s1467_s21 = smov %s1175_s22 }
 0x3e5   : > { %s1468_s22 = smov %s1179_s23  ;;  %s1469_s23 = smov %s1284_s19 }
 0x3e6   : > { %s1470_s24 = smov %s1273_s16  ;;  %26 = sbr.rel (!%p24_p4) target bundleno = 10 (0xa), region = 113 }
 0x3eb   :  { %757 = vsyncpa [#allocation3], 1 }
 0x3ec   :  { %759 = vsyncpa [#allocation3 + $0x1], 1 }
 0x3ed   :  { %760 = vsyncpa [#allocation6], 1 }
 0x3ee   :  { %761 = vsyncpa [#allocation4], 1 }
 0x3ef   :  { %763 = vsyncpa [#allocation4 + $0x1], 1 }
 0x3f0   :  { %764 = vsyncpa [#allocation10], 1 }
 0x3f1   :  { %766 = vsyncpa [#allocation10 + $0x1], 1 }

</bundles_post_ra>
